<compile_context>
chip_gen: v5e
topology: v5e:2x2
jax: 0.10.0
libtpu: 0.0.40
codegen_flags: <defaults>
</compile_context>

<pallas_src>
import jax
import jax.numpy as jnp
from jax.experimental import pallas as pl
from jax.experimental.pallas import tpu as pltpu

_MIB = 1 << 20


def _round_up(n, m):
    return ((n + m - 1) // m) * m


def _vmem_capacity_bytes():
    # Trace-time hardware query only; a failure here must not change kernel
    # semantics, so fall back to the most conservative generation (v7x: 64 MiB
    # per TensorCore) instead of raising.
    try:
        info = pltpu.get_tpu_info()
        for name in ("vmem_capacity_bytes", "vmem_size_bytes", "vmem_bytes"):
            cap = getattr(info, name, None)
            if cap:
                return int(cap)
    except Exception:  # best-effort query, never fatal
        pass
    return 64 * _MIB


def _highway_kernel(x_ref, w_ref, b_ref, o_ref):
    tn = o_ref.shape[-1]
    # One fused (tb, Dp) @ (Dp, 2*tn) MXU matmul, f32 accumulation.
    xm = x_ref[...].astype(w_ref.dtype)
    h = jnp.dot(xm, w_ref[...], preferred_element_type=jnp.float32) + b_ref[...]
    t = jax.nn.sigmoid(h[:, :tn])        # transform gate (EUP)
    g = jnp.maximum(h[:, tn:], 0.0)      # relu(fc2(x))   (VPU)
    # Load the skip slice AFTER the matmul so the f32 x tile is not pinned in
    # vregs across the MXU phase (load slots are idle during it anyway).
    col = pl.multiple_of(pl.program_id(1) * tn, 128)
    x = x_ref[:, pl.ds(col, tn)].astype(jnp.float32)
    # t*g + (1-t)*x  ==  x + t*(g - x)
    o_ref[...] = (x + t * (g - x)).astype(o_ref.dtype)


def highway(x, w1, b1, w2, b2, *, batch_tile=None,
            weight_dtype=jnp.bfloat16, out_dtype=None):
    """Highway forward pass.

    x : (B, D)
    w1, w2 : (D, D) pre-transposed (in, out) -> kernel computes x @ W
    b1, b2 : (D,)

    Note: matmul inputs are rounded to `weight_dtype` (bf16 by default) for the
    MXU with f32 accumulation; results differ from f32 PyTorch Linear by
    ~bf16 rounding.  The skip connection stays f32.
    """
    B, D = x.shape
    Dp = _round_up(D, 128)                       # lane-dense feature dim
    wd = jnp.dtype(weight_dtype)
    out_dtype = x.dtype if out_dtype is None else jnp.dtype(out_dtype)
    x_itemsize = jnp.dtype(x.dtype).itemsize
    out_itemsize = jnp.dtype(out_dtype).itemsize

    # ---- generation-aware VMEM budget ---------------------------------------
    budget = int(0.8 * _vmem_capacity_bytes())   # headroom for compiler scratch

    # ---- column (N) tiling of the fused weight ------------------------------
    # Stream weight column blocks only when the (double-buffered) fused weight
    # would eat too much VMEM; triggers earlier on v7x than on v5e/v6e.
    weight_budget = budget // 4
    m = Dp // 128
    tn = 128
    for d in range(m, 0, -1):                    # largest divisor tile that fits
        if m % d == 0 and Dp * (2 * 128 * d) * wd.itemsize <= weight_budget:
            tn = 128 * d
            break
    nc = Dp // tn
    w_bufs = 2                                   # BlockSpec double-buffers
    w_block_bytes = Dp * 2 * tn * wd.itemsize

    # ---- batch tile: ~2 MiB x-tile, >=2 tiles for megacore, fits VMEM -------
    if batch_tile is not None:
        tb = max(8, _round_up(batch_tile, 8))
    else:
        tb = max(256, min(_round_up(max((2 * _MIB) // (Dp * 4), 8), 8), 4096))
    # Small batches: shrink the tile so the grid still has >=2 tiles (both v7x
    # TensorCores get work) rather than one oversized, mostly-empty tile.
    tb = min(tb, _round_up(max(-(-B // 2), 8), 8))

    def footprint(tb_):
        return (w_bufs * w_block_bytes           # fused weight block(s)
                + w_bufs * 2 * tn * 4            # fused bias block(s)
                + 2 * tb_ * Dp * x_itemsize      # double-buffered x tile
                + 2 * tb_ * tn * out_itemsize    # double-buffered out tile
                + tb_ * 2 * tn * 4)              # f32 matmul result

    while footprint(tb) > budget and tb > 8:
        tb = max(8, _round_up(tb // 2, 8))
    nb = pl.cdiv(B, tb)
    vmem_limit = int(min(budget, max(32 * _MIB, int(1.25 * footprint(tb)))))

    # ---- parameter plumbing (one-time per weight set in a real model) -------
    if D != Dp:
        w1p = jnp.zeros((Dp, Dp), wd).at[:D, :D].set(w1.astype(wd))
        w2p = jnp.zeros((Dp, Dp), wd).at[:D, :D].set(w2.astype(wd))
        b1p = jnp.zeros((Dp,), jnp.float32).at[:D].set(b1.astype(jnp.float32))
        b2p = jnp.zeros((Dp,), jnp.float32).at[:D].set(b2.astype(jnp.float32))
        # Padded feature lanes of x must be REAL zeros (garbage * 0-weight =
        # NaN would poison every output row, not just discarded ones).
        xk = jnp.zeros((B, Dp), x.dtype).at[:, :D].set(x)
    else:
        w1p, w2p = w1.astype(wd), w2.astype(wd)
        b1p, b2p = b1.astype(jnp.float32), b2.astype(jnp.float32)
        xk = x                                   # no pad/slice HBM round trips
    # Interleave per column tile j: cols [2*j*tn : 2*j*tn+tn]   = W1[:, j-tile]
    #                               cols [2*j*tn+tn : 2*(j+1)*tn] = W2[:, j-tile]
    w12 = jnp.stack([w1p.reshape(Dp, nc, tn), w2p.reshape(Dp, nc, tn)],
                    axis=2).reshape(Dp, 2 * Dp)
    b12 = jnp.stack([b1p.reshape(nc, tn), b2p.reshape(nc, tn)],
                    axis=1).reshape(1, 2 * Dp)

    out = pl.pallas_call(
        _highway_kernel,
        out_shape=jax.ShapeDtypeStruct((B, Dp), out_dtype),
        grid_spec=pltpu.PrefetchScalarGridSpec(
            num_scalar_prefetch=0,
            grid=(nb, nc),
            in_specs=[
                pl.BlockSpec((tb, Dp), lambda i, j: (i, 0)),      # x (resident over j)
                pl.BlockSpec((Dp, 2 * tn), lambda i, j: (0, j)),  # fused W column block
                pl.BlockSpec((1, 2 * tn), lambda i, j: (0, j)),   # fused bias block
            ],
            out_specs=pl.BlockSpec((tb, tn), lambda i, j: (i, j)),
        ),
        compiler_params=pltpu.CompilerParams(
            dimension_semantics=("parallel", "arbitrary"),
            vmem_limit_bytes=vmem_limit,
        ),
    )(xk, w12, b12)

    return out if D == Dp else out[:, :D]


def highway_ref(x, w1, b1, w2, b2, *, matmul_dtype=jnp.bfloat16):
    # Reference uses the same bf16-rounded matmul inputs as the kernel so the
    # comparison isolates kernel correctness from the quantization choice.
    f32 = jnp.float32
    xm = x.astype(matmul_dtype).astype(f32)
    w1m = w1.astype(matmul_dtype).astype(f32)
    w2m = w2.astype(matmul_dtype).astype(f32)
    t = jax.nn.sigmoid(xm @ w1m + b1.astype(f32))
    g = jnp.maximum(xm @ w2m + b2.astype(f32), 0.0)
    xs = x.astype(f32)
    return (xs + t * (g - xs)).astype(x.dtype)


if __name__ == "__main__":
    B = 8          # batch
    D = 32         # input_size (hidden)

    key = jax.random.PRNGKey(0)
    kx, k1, k2, k3, k4 = jax.random.split(key, 5)

    # Deterministic init mimicking nn.Linear's U(-1/sqrt(D), 1/sqrt(D)).
    bound = 1.0 / (D ** 0.5)
    x = jax.random.normal(kx, (B, D), dtype=jnp.float32)
    w1 = jax.random.uniform(k1, (D, D), jnp.float32, -bound, bound)  # (in, out)
    b1 = jax.random.uniform(k2, (D,), jnp.float32, -bound, bound)
    w2 = jax.random.uniform(k3, (D, D), jnp.float32, -bound, bound)  # (in, out)
    b2 = jax.random.uniform(k4, (D,), jnp.float32, -bound, bound)

    out = jax.block_until_ready(highway(x, w1, b1, w2, b2))
    ref = highway_ref(x, w1, b1, w2, b2)

    assert out.shape == (B, D)
    assert jnp.allclose(out, ref, atol=2e-4, rtol=2e-4), "mismatch vs reference"

    print("KERNEL_OK")
</pallas_src>

<mosaic_0001>
module attributes {stable_mosaic.version = 11 : i64} {
  func.func @_highway_kernel(%arg0: i32, %arg1: i32, %arg2: memref<8x128xf32, #tpu.memory_space<vmem>>, %arg3: memref<128x256xbf16, #tpu.memory_space<vmem>>, %arg4: memref<1x256xf32, #tpu.memory_space<vmem>>, %arg5: memref<8x128xf32, #tpu.memory_space<vmem>>) attributes {dimension_semantics = [#tpu.dimension_semantics<parallel>, #tpu.dimension_semantics<arbitrary>], iteration_bounds = array<i64: 1, 1>, scalar_prefetch = 0 : i64, scratch_operands = 0 : i64, tpu.core_type = #tpu.core_type<tc>, window_params = [{transform_indices = @transform_0, window_bounds = array<i64: 8, 128>}, {transform_indices = @transform_1, window_bounds = array<i64: 128, 256>}, {transform_indices = @transform_2, window_bounds = array<i64: 1, 256>}, {transform_indices = @transform_3, window_bounds = array<i64: 8, 128>}]} {
    %c0 = arith.constant 0 : index
    %c0_0 = arith.constant 0 : index
    %0 = vector.load %arg2[%c0, %c0_0] : memref<8x128xf32, #tpu.memory_space<vmem>>, vector<8x128xf32>
    %1 = arith.truncf %0 : vector<8x128xf32> to vector<8x128xbf16>
    %c0_1 = arith.constant 0 : index
    %c0_2 = arith.constant 0 : index
    %2 = vector.load %arg3[%c0_1, %c0_2] : memref<128x256xbf16, #tpu.memory_space<vmem>>, vector<128x256xbf16>
    %cst = arith.constant dense<0.000000e+00> : vector<8x256xf32>
    %3 = tpu.matmul %1, %2, %cst {dimension_numbers = #tpu.dot_dimension_numbers<[1], [0], [0], [1], [0, 0, 1, 1], [], []>} : vector<8x128xbf16>, vector<128x256xbf16>, vector<8x256xf32> -> vector<8x256xf32>
    %c0_3 = arith.constant 0 : index
    %c0_4 = arith.constant 0 : index
    %4 = vector.load %arg4[%c0_3, %c0_4] : memref<1x256xf32, #tpu.memory_space<vmem>>, vector<1x256xf32>
    %5 = vector.broadcast %4 : vector<1x256xf32> to vector<8x256xf32>
    %6 = arith.addf %3, %5 : vector<8x256xf32>
    %7 = vector.extract_strided_slice %6 {offsets = [0, 0], sizes = [8, 128], strides = [1, 1]} : vector<8x256xf32> to vector<8x128xf32>
    %8 = arith.negf %7 : vector<8x128xf32>
    %9 = math.exp %8 : vector<8x128xf32>
    %cst_5 = arith.constant 1.000000e+00 : f32
    %10 = vector.broadcast %cst_5 : f32 to vector<8x128xf32>
    %11 = arith.addf %10, %9 : vector<8x128xf32>
    %12 = arith.divf %10, %11 : vector<8x128xf32>
    %13 = vector.extract_strided_slice %6 {offsets = [0, 128], sizes = [8, 128], strides = [1, 1]} : vector<8x256xf32> to vector<8x128xf32>
    %cst_6 = arith.constant 0.000000e+00 : f32
    %14 = vector.broadcast %cst_6 : f32 to vector<8x128xf32>
    %15 = arith.maximumf %13, %14 : vector<8x128xf32>
    %c128_i32 = arith.constant 128 : i32
    %16 = arith.muli %arg1, %c128_i32 : i32
    %17 = tpu.assume_multiple %16, 128 : i32
    %c0_7 = arith.constant 0 : index
    %18 = arith.index_cast %17 : i32 to index
    %19 = vector.load %arg2[%c0_7, %18] : memref<8x128xf32, #tpu.memory_space<vmem>>, vector<8x128xf32>
    %20 = arith.subf %15, %19 : vector<8x128xf32>
    %21 = arith.mulf %12, %20 : vector<8x128xf32>
    %22 = arith.addf %19, %21 : vector<8x128xf32>
    %c0_8 = arith.constant 0 : index
    %c0_9 = arith.constant 0 : index
    %23 = vector.load %arg5[%c0_8, %c0_9] : memref<8x128xf32, #tpu.memory_space<vmem>>, vector<8x128xf32>
    tpu.vector_store %arg5[%c0_8, %c0_9], %22 {strides = array<i32>} : memref<8x128xf32, #tpu.memory_space<vmem>>, vector<8x128xf32>,
    return
  }
  func.func @transform_0(%arg0: i32, %arg1: i32) -> (i32, i32) {
    %c0_i32 = arith.constant 0 : i32
    %c0_i32_0 = arith.constant 0 : i32
    return %arg0, %c0_i32 : i32, i32
  }
  func.func @transform_1(%arg0: i32, %arg1: i32) -> (i32, i32) {
    %c0_i32 = arith.constant 0 : i32
    %c0_i32_0 = arith.constant 0 : i32
    return %c0_i32, %arg1 : i32, i32
  }
  func.func @transform_2(%arg0: i32, %arg1: i32) -> (i32, i32) {
    %c0_i32 = arith.constant 0 : i32
    %c0_i32_0 = arith.constant 0 : i32
    return %c0_i32, %arg1 : i32, i32
  }
  func.func @transform_3(%arg0: i32, %arg1: i32) -> (i32, i32) {
    %c0_i32 = arith.constant 0 : i32
    return %arg0, %arg1 : i32, i32
  }
}

</mosaic_0001>

<bundles_post_ra>
// kernel: tpu_custom_call.1
= control target key start
LH: loop header
LB: loop body
LE: loop exit
PB: predicated region body
PF: predicated region fallthrough
CT: control target
= control target key end

     0   :  { %8 = vsyncpa [#allocation3], 0  ;;  %s467_s0 = inlined_call_operand.hbm [shape: f32[8,128], index: 0, kind: input, shape index: {}]   ;;  %s468_s1 = inlined_call_operand.hbm [shape: bf16[128,256], index: 1, kind: input, shape index: {}]   ;;  %s469_s2 = inlined_call_operand.hbm [shape: f32[1,256], index: 2, kind: input, shape index: {}]   ;;  %s470_s3 = inlined_call_operand.hbm [shape: f32[8,128], index: 3, kind: output, shape index: {}]  }
   0x1   :  { %9 = vsyncpa [#allocation6], 0  ;;  %s26_s14 = sshll.u32 %s468_s1, 4  ;;  %s27_s14 = int_to_ptr.hbm [resolvable:$true] %s26_s14 }
   0x2   :  { %10 = vsyncpa [#allocation4], 0  ;;  %s429_s15 = smov [#allocation5]   ;;  %s16_s19 = sshll.u32 %s467_s0, 4  ;;  %s17_s19 = int_to_ptr.hbm [resolvable:$true] %s16_s19 }
   0x3   :  { %s28_s16 = sshll.u32 %s429_s15, 4  ;;  %s430_s20 = smov 128   ;;  %s29_s16 = int_to_ptr.vmem [resolvable:$true] %s28_s16 }
   0x4   :  { %s431_s21 = smov 8   ;;  %s432_s22 = smov [#allocation2]  }
   0x5   :  { %34 = dma.hbm_to_vmem [thread:$0]  %s27_s14, 2048, %s29_s16, [#allocation6], %s430_s20, %s430_s20, %s431_s21  }
   0x6   :  { %s18_s23 = sshll.u32 %s432_s22, 4  ;;  %s40_s26 = sshll.u32 %s469_s2, 4  ;;  %s19_s23 = int_to_ptr.vmem [resolvable:$true] %s18_s23  ;;  %s41_s26 = int_to_ptr.hbm [resolvable:$true] %s40_s26 }
   0x7   :  { %21 = dma.hbm_to_vmem [thread:$0]  %s17_s19, 128, %s19_s23, [#allocation3]  }
   0x8   :  { %s433_s1 = smov [#allocation7]  }
   0x9   :  { %s42_s27 = sshll.u32 %s433_s1, 4  ;;  %s43_s27 = int_to_ptr.vmem [resolvable:$true] %s42_s27 }
   0xa   :  { %45 = dma.hbm_to_vmem [thread:$0]  %s41_s26, 32, %s43_s27, [#allocation6]  }
   0xb   :  { %423 = dma.done.wait [#allocation3], 128  }
   0xc   :  { %424 = vsyncadd [#allocation3], 4294967168 }
   0xd   :  { %425 = dma.done.wait [#allocation6], 2080  }
   0xe   :  { %426 = vsyncadd [#allocation6], 4294965216  ;;  %v294_v0 = vld [vmem:[#allocation5 + $0x70] sm:$0xf]  ;;  %v316_v1 = vld [vmem:[#allocation5 + $0x74] sm:$0xf0] }
   0xf   :  { %v286_v2 = vld [vmem:[#allocation5 + $0x60] sm:$0xf]  ;;  %v295_v3 = vor.u32 %v316_v1, %v294_v0  ;;  %v314_v4 = vld [vmem:[#allocation5 + $0x64] sm:$0xf0]  ;;  %v315_v6 = vld [vmem:[#allocation5 + $0x74] sm:$0xf] }
  0x10   :  { %v287_v5 = vor.u32 %v314_v4, %v286_v2  ;;  %v296_v7 = vld [vmem:[#allocation5 + $0x78] sm:$0xf0]  ;;  %v278_v8 = vld [vmem:[#allocation5 + $0x50] sm:$0xf]  ;;  %v312_v9 = vld [vmem:[#allocation5 + $0x54] sm:$0xf0] }
  0x11   :  { %162 = vmatpush.bf16.msra.mxu0 %v295_v3  ;;  %v299_v10 = vor.u32 %v315_v6, %v296_v7  ;;  %v313_v11 = vld [vmem:[#allocation5 + $0x64] sm:$0xf]  ;;  %v288_v12 = vld [vmem:[#allocation5 + $0x68] sm:$0xf0]  ;;  %v279_v14 = vor.u32 %v312_v9, %v278_v8  ;;  %v311_v15 = vld [vmem:[#allocation5 + $0x54] sm:$0xf] }
  0x12   :  { %v291_v13 = vor.u32 %v313_v11, %v288_v12  ;;  %v280_v16 = vld [vmem:[#allocation5 + $0x58] sm:$0xf0]  ;;  %v270_v17 = vld [vmem:[#allocation5 + $0x40] sm:$0xf]  ;;  %v310_v18 = vld [vmem:[#allocation5 + $0x44] sm:$0xf0] }
  0x13   :  { %175 = vmatpush.bf16.msra.mxu1 %v299_v10  ;;  %v283_v19 = vor.u32 %v311_v15, %v280_v16  ;;  %v271_v20 = vor.u32 %v310_v18, %v270_v17  ;;  %v309_v21 = vld [vmem:[#allocation5 + $0x44] sm:$0xf]  ;;  %v272_v22 = vld [vmem:[#allocation5 + $0x48] sm:$0xf0]  ;;  %v262_v23 = vld [vmem:[#allocation5 + $0x30] sm:$0xf] }
  0x14   :  { %v308_v24 = vld [vmem:[#allocation5 + $0x34] sm:$0xf0]  ;;  %v275_v25 = vor.u32 %v309_v21, %v272_v22  ;;  %v307_v27 = vld [vmem:[#allocation5 + $0x34] sm:$0xf]  ;;  %v264_v28 = vld [vmem:[#allocation5 + $0x38] sm:$0xf0] }
  0x15   :  { %163 = vmatpush.bf16.msra.mxu0 %v287_v5  ;;  %v263_v26 = vor.u32 %v308_v24, %v262_v23  ;;  %v254_v29 = vld [vmem:[#allocation5 + $0x20] sm:$0xf]  ;;  %v306_v30 = vld [vmem:[#allocation5 + $0x24] sm:$0xf0]  ;;  %v267_v31 = vor.u32 %v307_v27, %v264_v28  ;;  %v305_v33 = vld [vmem:[#allocation5 + $0x24] sm:$0xf] }
  0x16   :  { %v255_v32 = vor.u32 %v306_v30, %v254_v29  ;;  %v256_v34 = vld [vmem:[#allocation5 + $0x28] sm:$0xf0]  ;;  %v246_v35 = vld [vmem:[#allocation5 + $0x10] sm:$0xf]  ;;  %v304_v36 = vld [vmem:[#allocation5 + $0x14] sm:$0xf0] }
  0x17   :  { %176 = vmatpush.bf16.msra.mxu1 %v291_v13  ;;  %v259_v37 = vor.u32 %v305_v33, %v256_v34  ;;  %v247_v38 = vor.u32 %v304_v36, %v246_v35  ;;  %v303_v39 = vld [vmem:[#allocation5 + $0x14] sm:$0xf]  ;;  %v248_v40 = vld [vmem:[#allocation5 + $0x18] sm:$0xf0]  ;;  %v238_v41 = vld [vmem:[#allocation5] sm:$0xf] }
  0x18   :  { %v302_v42 = vld [vmem:[#allocation5 + $0x4] sm:$0xf0]  ;;  %v251_v43 = vor.u32 %v303_v39, %v248_v40  ;;  %v58_v45 = vld [vmem:[#allocation2] sm:$0xff]  ;;  %v301_v46 = vld [vmem:[#allocation5 + $0x4] sm:$0xf]  ;;  %s434_s0 = smov [#allocation8]  }
  0x19   :  { %164 = vmatpush.bf16.msra.mxu0 %v279_v14  ;;  %v239_v44 = vor.u32 %v302_v42, %v238_v41  ;;  %v240_v47 = vld [vmem:[#allocation5 + $0x8] sm:$0xf0]  ;;  %v59_v48 = vpack.c.bf16 %v58_v45, %v58_v45  ;;  %v76_v50 = vld [vmem:[#allocation7] sm:$0x3]  ;;  %s222_s2 = sshll.u32 %s434_s0, 4  ;;  %s224_s30 = sshll.u32 %s470_s3, 4  ;;  %s223_s2 = int_to_ptr.vmem [resolvable:$true] %s222_s2  ;;  %s225_s30 = int_to_ptr.hbm [resolvable:$true] %s224_s30 }
  0x1a   :  { %v243_v49 = vor.u32 %v301_v46, %v240_v47  ;;  %v78_v51 = vperm.slane %v76_v50, 0  ;;  %v79_v60 = vperm.slane %v76_v50, 1 }
  0x1b   :  { %177 = vmatpush.bf16.msra.mxu1 %v283_v19 }
  0x1d   :  { %165 = vmatpush.bf16.msra.mxu0 %v271_v20 }
  0x1f   :  { %178 = vmatpush.bf16.msra.mxu1 %v275_v25 }
  0x21   :  { %166 = vmatpush.bf16.msra.mxu0 %v263_v26 }
  0x23   :  { %179 = vmatpush.bf16.msra.mxu1 %v267_v31 }
  0x25   :  { %167 = vmatpush.bf16.msra.mxu0 %v255_v32 }
  0x27   :  { %180 = vmatpush.bf16.msra.mxu1 %v259_v37 }
  0x29   :  { %168 = vmatpush.bf16.msra.mxu0 %v247_v38 }
  0x2b   :  { %181 = vmatpush.bf16.msra.mxu1 %v251_v43 }
  0x2d   :  { %169 = vmatpush.bf16.msra.mxu0 %v239_v44 }
  0x2f   :  { %182 = vmatpush.bf16.msra.mxu1 %v243_v49 }
  0x30   :  { %170 = vmatmul.bf16.vlgmr.msra.gmra.mxu0 %v59_v48 }
  0x32   :  { %183 = vmatmul.bf16.vlgmr.msra.gmra.mxu1 %v59_v48 }
  0xad   :  { %v171_v52 = vpop.f32.mrf.mxu0 }
  0xae   :  { %v172_v53 = vadd.f32 %v171_v52, %v78_v51 }
  0xaf   :  { %v184_v55 = vpop.f32.mrf.mxu1 }
  0xb0   :  { %v300_v54 = vmul.f32 -1.442695, %v172_v53  ;;  %v185_v61 = vadd.f32 %v184_v55, %v79_v60 }
  0xb2   :  { %323 = vpow2.f32 %v300_v54  ;;  %v207_v1 = vmax.f32 %v185_v61, 0.0 }
  0xb4   :  { %v213_v6 = vsub.f32 %v207_v1, %v58_v45 }
  0xb5   :  { %v173_v56 = vpop.f32.mrf.mxu0 }
  0xb7   :  { %v186_v58 = vpop.f32.mrf.mxu1 }
  0xb8   :  { %v324_v57 = vpop.eup %323 }
  0xb9   :  { %v191_v59 = vadd.f32 1.0, %v324_v57 }
  0xbb   :  { %325 = vrcp.f32 %v191_v59  ;;  %v203_v2 = vand.u32 2147483648, %v191_v59  ;;  %v201_v4 = vand.u32 2147483647, %v191_v59  ;;  %vm197_vm1 = vweird.f32 %v191_v59 }
  0xbd   :  { %v204_v7 = vor.u32 1.1754944e-38, %v203_v2  ;;  %vm202_vm3 = vcmp.eq.f32.partialorder %v201_v4, 8.507059e+37 }
  0xc1   :  { %v326_v62 = vpop.eup %325 }
  0xc2   :  { %v193_v63 = vmul.f32 %v326_v62, %v191_v59  ;;  %vm198_vm0 = vweird.f32 %v326_v62 }
  0xc3   :  { %vm199_vm2 = vmor %vm197_vm1, %vm198_vm0 }
  0xc4   :  { %v194_v0 = vsub.f32 1.0, %v193_v63 }
  0xc6   :  { %v195_v3 = vmul.f32 %v326_v62, %v194_v0 }
  0xc8   :  { %v196_v5 = vadd.f32 %v326_v62, %v195_v3 }
  0xca   :  { %v200_v8 = vsel %vm199_vm2, %v326_v62, %v196_v5 }
  0xcb   :  { %v205_v9 = vsel %vm202_vm3, %v204_v7, %v200_v8 }
  0xcc   :  { %v214_v10 = vmul.f32 %v213_v6, %v205_v9 }
  0xce   :  { %v215_v11 = vadd.f32 %v214_v10, %v58_v45 }
  0xd0   :  { %216 = vst [vmem:[#allocation8] sm:$0xff] %v215_v11 }
  0xd1   :  { %227 = dma.vmem_to_hbm [thread:$0]  %s223_s2, 128, %s225_s30, [#allocation4]  }
  0xd2   :  { %427 = dma.done.wait [#allocation4], 128  }
  0xd3   :  { %428 = vsyncadd [#allocation4], 4294967168 }
  0xd4   :  { %232 = vsyncpa [#allocation3], 1 }
  0xd5   :  { %233 = vsyncpa [#allocation6], 1 }
  0xd6   :  { %234 = vsyncpa [#allocation4], 1 }

</bundles_post_ra>
